<compile_context>
chip_gen: v5e
topology: v5e:2x2
jax: 0.10.0
libtpu: 0.0.40
codegen_flags: <defaults>
</compile_context>

<pallas_src>
import jax
import jax.numpy as jnp
from jax.experimental import pallas as pl
from jax.experimental.pallas import tpu as pltpu

IN_DIM, H1, H2, OUT = 784, 128, 64, 10
LANES = 128          # lane-dense width for the small layers / output
NEG_BIG = -1e30      # "minus infinity" for padded logit lanes (avoids inf-inf NaN)


def mlp_kernel(x_ref, w1_ref, b1_ref, w2_ref, b2_ref, w3_ref, b3_ref, o_ref):
    # Cast x to bf16 in-kernel (MXU-native operands, f32 accumulation).
    x = x_ref[...].astype(jnp.bfloat16)

    # fc1 + relu
    h1 = jnp.dot(x, w1_ref[...], preferred_element_type=jnp.float32)
    h1 = jnp.maximum(h1 + b1_ref[...], 0.0)

    # fc2 + relu  (W2 is zero-padded to 128 output lanes; padded lanes stay 0)
    h2 = jnp.dot(h1.astype(jnp.bfloat16), w2_ref[...],
                 preferred_element_type=jnp.float32)
    h2 = jnp.maximum(h2 + b2_ref[...], 0.0)

    # fc3  (W3 zero-padded; padded lanes get a -1e30 bias -> exp() == 0 below)
    logits = jnp.dot(h2.astype(jnp.bfloat16), w3_ref[...],
                     preferred_element_type=jnp.float32)
    logits = logits + b3_ref[...]

    # softmax over the feature axis (PyTorch dim=1) — exact normalization.
    m = jnp.max(logits, axis=-1, keepdims=True)
    e = jnp.exp(logits - m)
    o_ref[...] = e / jnp.sum(e, axis=-1, keepdims=True)


def prepare_params(w1, b1, w2, b2, w3, b3):
    """One-time weight prep (outside the hot path): bf16 cast + 128-lane padding."""
    w1p = w1.astype(jnp.bfloat16)                                        # (784, 128)
    b1p = b1.reshape(1, -1).astype(jnp.float32)                          # (1, 128)

    w2p = jnp.zeros((H1, LANES), jnp.bfloat16).at[:, :H2].set(
        w2.astype(jnp.bfloat16))                                         # (128, 128)
    b2p = jnp.zeros((1, LANES), jnp.float32).at[:, :H2].set(
        b2.reshape(1, -1).astype(jnp.float32))                           # (1, 128)

    w3p = jnp.zeros((LANES, LANES), jnp.bfloat16).at[:H2, :OUT].set(
        w3.astype(jnp.bfloat16))                                         # (128, 128)
    b3p = jnp.full((1, LANES), NEG_BIG, jnp.float32).at[:, :OUT].set(
        b3.reshape(1, -1).astype(jnp.float32))                           # (1, 128)
    return w1p, b1p, w2p, b2p, w3p, b3p


def _round_up(n, m):
    return ((n + m - 1) // m) * m


def mlp_forward(x, params, *, tb=512):
    """x: (B, 784) float32. Returns (B, 10) softmax probabilities (float32)."""
    w1p, b1p, w2p, b2p, w3p, b3p = params
    B, in_dim = x.shape

    # Batch tile: multiple of 8 sublanes, capped at `tb`; for batches >= 16 rows make
    # sure there are at least 2 tiles so both v7x TensorCores get work.
    # (tb can be swept to 1024/2048; at >=2048 set vmem_limit_bytes for v5e.)
    B8 = _round_up(B, 8)
    TB = min(tb, B8)
    if B8 >= 16:
        TB = min(TB, _round_up(pl.cdiv(B8, 2), 8))
    TB = max(TB, 8)
    n_tiles = pl.cdiv(B, TB)

    # Weights/biases stay resident in VMEM across all batch tiles.
    def resident(a):
        return pl.BlockSpec(a.shape, lambda i: (0,) * a.ndim)

    out = pl.pallas_call(
        mlp_kernel,
        out_shape=jax.ShapeDtypeStruct((B, LANES), jnp.float32),
        grid=(n_tiles,),
        in_specs=[
            pl.BlockSpec((TB, in_dim), lambda i: (i, 0)),   # f32 x tile walks the batch
            resident(w1p), resident(b1p),
            resident(w2p), resident(b2p),
            resident(w3p), resident(b3p),
        ],
        out_specs=pl.BlockSpec((TB, LANES), lambda i: (i, 0)),  # lane-dense writeback
        compiler_params=pltpu.CompilerParams(
            dimension_semantics=("parallel",),  # shard batch tiles across TCs (v7x)
        ),
    )(x, w1p, b1p, w2p, b2p, w3p, b3p)
    return out[:, :OUT]


def init_params(key):
    # Deterministic synthetic init mimicking PyTorch Linear default
    # (uniform in [-1/sqrt(fan_in), 1/sqrt(fan_in)]).  W stored (fan_in, fan_out).
    dims = [(IN_DIM, H1), (H1, H2), (H2, OUT)]
    params = []
    for fan_in, fan_out in dims:
        kw, kb, key = jax.random.split(key, 3)
        bound = 1.0 / (fan_in ** 0.5)
        w = jax.random.uniform(kw, (fan_in, fan_out), jnp.float32, -bound, bound)
        b = jax.random.uniform(kb, (fan_out,), jnp.float32, -bound, bound)
        params += [w, b]
    return params


if __name__ == "__main__":
    key = jax.random.PRNGKey(0)
    kx, kp = jax.random.split(key)

    B = 32  # small batch; exercises the 2-tile grid path
    x = jax.random.normal(kx, (B, IN_DIM), dtype=jnp.float32)
    w1, b1, w2, b2, w3, b3 = init_params(kp)

    prepared = prepare_params(w1, b1, w2, b2, w3, b3)
    out = mlp_forward(x, prepared)
    out = jax.block_until_ready(out)

    # sanity: shape + softmax rows sum to 1 (exact normalization in-kernel)
    assert out.shape == (B, OUT)
    assert bool(jnp.allclose(jnp.sum(out, axis=1), 1.0, atol=1e-3))

    # reference check in plain JAX (f32); tolerance loosened for bf16 matmul inputs
    h1 = jnp.maximum(x @ w1 + b1, 0.0)
    h2 = jnp.maximum(h1 @ w2 + b2, 0.0)
    logits = h2 @ w3 + b3
    ref = jax.nn.softmax(logits, axis=1)
    assert bool(jnp.allclose(out, ref, atol=2e-2, rtol=2e-2))

    print("KERNEL_OK")
</pallas_src>

<mosaic_0001>
module attributes {stable_mosaic.version = 11 : i64} {
  func.func @mlp_kernel(%arg0: i32, %arg1: memref<16x784xf32, #tpu.memory_space<vmem>>, %arg2: memref<784x128xbf16, #tpu.memory_space<vmem>>, %arg3: memref<1x128xf32, #tpu.memory_space<vmem>>, %arg4: memref<128x128xbf16, #tpu.memory_space<vmem>>, %arg5: memref<1x128xf32, #tpu.memory_space<vmem>>, %arg6: memref<128x128xbf16, #tpu.memory_space<vmem>>, %arg7: memref<1x128xf32, #tpu.memory_space<vmem>>, %arg8: memref<16x128xf32, #tpu.memory_space<vmem>>) attributes {dimension_semantics = [#tpu.dimension_semantics<parallel>], iteration_bounds = array<i64: 2>, scalar_prefetch = 0 : i64, scratch_operands = 0 : i64, tpu.core_type = #tpu.core_type<tc>, window_params = [{transform_indices = @transform_0, window_bounds = array<i64: 16, 784>}, {pipeline_mode = #tpu.pipeline_mode<synchronous>, transform_indices = @transform_1, window_bounds = array<i64: 784, 128>}, {pipeline_mode = #tpu.pipeline_mode<synchronous>, transform_indices = @transform_2, window_bounds = array<i64: 1, 128>}, {pipeline_mode = #tpu.pipeline_mode<synchronous>, transform_indices = @transform_3, window_bounds = array<i64: 128, 128>}, {pipeline_mode = #tpu.pipeline_mode<synchronous>, transform_indices = @transform_4, window_bounds = array<i64: 1, 128>}, {pipeline_mode = #tpu.pipeline_mode<synchronous>, transform_indices = @transform_5, window_bounds = array<i64: 128, 128>}, {pipeline_mode = #tpu.pipeline_mode<synchronous>, transform_indices = @transform_6, window_bounds = array<i64: 1, 128>}, {transform_indices = @transform_7, window_bounds = array<i64: 16, 128>}]} {
    %c0 = arith.constant 0 : index
    %c0_0 = arith.constant 0 : index
    %0 = vector.load %arg1[%c0, %c0_0] : memref<16x784xf32, #tpu.memory_space<vmem>>, vector<16x784xf32>
    %1 = arith.truncf %0 : vector<16x784xf32> to vector<16x784xbf16>
    %c0_1 = arith.constant 0 : index
    %c0_2 = arith.constant 0 : index
    %2 = vector.load %arg2[%c0_1, %c0_2] : memref<784x128xbf16, #tpu.memory_space<vmem>>, vector<784x128xbf16>
    %cst = arith.constant dense<0.000000e+00> : vector<16x128xf32>
    %3 = tpu.matmul %1, %2, %cst {dimension_numbers = #tpu.dot_dimension_numbers<[1], [0], [0], [1], [0, 0, 1, 1], [], []>} : vector<16x784xbf16>, vector<784x128xbf16>, vector<16x128xf32> -> vector<16x128xf32>
    %c0_3 = arith.constant 0 : index
    %c0_4 = arith.constant 0 : index
    %4 = vector.load %arg3[%c0_3, %c0_4] : memref<1x128xf32, #tpu.memory_space<vmem>>, vector<1x128xf32>
    %5 = vector.broadcast %4 : vector<1x128xf32> to vector<16x128xf32>
    %6 = arith.addf %3, %5 : vector<16x128xf32>
    %cst_5 = arith.constant 0.000000e+00 : f32
    %7 = vector.broadcast %cst_5 : f32 to vector<16x128xf32>
    %8 = arith.maximumf %6, %7 : vector<16x128xf32>
    %9 = arith.truncf %8 : vector<16x128xf32> to vector<16x128xbf16>
    %c0_6 = arith.constant 0 : index
    %c0_7 = arith.constant 0 : index
    %10 = vector.load %arg4[%c0_6, %c0_7] : memref<128x128xbf16, #tpu.memory_space<vmem>>, vector<128x128xbf16>
    %cst_8 = arith.constant dense<0.000000e+00> : vector<16x128xf32>
    %11 = tpu.matmul %9, %10, %cst_8 {dimension_numbers = #tpu.dot_dimension_numbers<[1], [0], [0], [1], [0, 0, 1, 1], [], []>} : vector<16x128xbf16>, vector<128x128xbf16>, vector<16x128xf32> -> vector<16x128xf32>
    %c0_9 = arith.constant 0 : index
    %c0_10 = arith.constant 0 : index
    %12 = vector.load %arg5[%c0_9, %c0_10] : memref<1x128xf32, #tpu.memory_space<vmem>>, vector<1x128xf32>
    %13 = vector.broadcast %12 : vector<1x128xf32> to vector<16x128xf32>
    %14 = arith.addf %11, %13 : vector<16x128xf32>
    %cst_11 = arith.constant 0.000000e+00 : f32
    %15 = vector.broadcast %cst_11 : f32 to vector<16x128xf32>
    %16 = arith.maximumf %14, %15 : vector<16x128xf32>
    %17 = arith.truncf %16 : vector<16x128xf32> to vector<16x128xbf16>
    %c0_12 = arith.constant 0 : index
    %c0_13 = arith.constant 0 : index
    %18 = vector.load %arg6[%c0_12, %c0_13] : memref<128x128xbf16, #tpu.memory_space<vmem>>, vector<128x128xbf16>
    %cst_14 = arith.constant dense<0.000000e+00> : vector<16x128xf32>
    %19 = tpu.matmul %17, %18, %cst_14 {dimension_numbers = #tpu.dot_dimension_numbers<[1], [0], [0], [1], [0, 0, 1, 1], [], []>} : vector<16x128xbf16>, vector<128x128xbf16>, vector<16x128xf32> -> vector<16x128xf32>
    %c0_15 = arith.constant 0 : index
    %c0_16 = arith.constant 0 : index
    %20 = vector.load %arg7[%c0_15, %c0_16] : memref<1x128xf32, #tpu.memory_space<vmem>>, vector<1x128xf32>
    %21 = vector.broadcast %20 : vector<1x128xf32> to vector<16x128xf32>
    %22 = arith.addf %19, %21 : vector<16x128xf32>
    %cst_17 = arith.constant dense<0xFF800000> : vector<16xf32>
    %23 = vector.multi_reduction <maximumf>, %22, %cst_17 [1] : vector<16x128xf32> to vector<16xf32>
    %24 = vector.shape_cast %23 : vector<16xf32> to vector<16x1xf32>
    %25 = vector.broadcast %24 : vector<16x1xf32> to vector<16x128xf32>
    %26 = arith.subf %22, %25 : vector<16x128xf32>
    %27 = math.exp %26 : vector<16x128xf32>
    %cst_18 = arith.constant dense<0.000000e+00> : vector<16xf32>
    %28 = vector.multi_reduction <add>, %27, %cst_18 [1] : vector<16x128xf32> to vector<16xf32>
    %29 = vector.shape_cast %28 : vector<16xf32> to vector<16x1xf32>
    %30 = vector.broadcast %29 : vector<16x1xf32> to vector<16x128xf32>
    %31 = arith.divf %27, %30 : vector<16x128xf32>
    %c0_19 = arith.constant 0 : index
    %c0_20 = arith.constant 0 : index
    %32 = vector.load %arg8[%c0_19, %c0_20] : memref<16x128xf32, #tpu.memory_space<vmem>>, vector<16x128xf32>
    tpu.vector_store %arg8[%c0_19, %c0_20], %31 {strides = array<i32>} : memref<16x128xf32, #tpu.memory_space<vmem>>, vector<16x128xf32>,
    return
  }
  func.func @transform_0(%arg0: i32) -> (i32, i32) {
    %c0_i32 = arith.constant 0 : i32
    %c0_i32_0 = arith.constant 0 : i32
    return %arg0, %c0_i32 : i32, i32
  }
  func.func @transform_1(%arg0: i32) -> (i32, i32) {
    %c0_i32 = arith.constant 0 : i32
    %c0_i32_0 = arith.constant 0 : i32
    %c0_i32_1 = arith.constant 0 : i32
    return %c0_i32, %c0_i32_0 : i32, i32
  }
  func.func @transform_2(%arg0: i32) -> (i32, i32) {
    %c0_i32 = arith.constant 0 : i32
    %c0_i32_0 = arith.constant 0 : i32
    %c0_i32_1 = arith.constant 0 : i32
    return %c0_i32, %c0_i32_0 : i32, i32
  }
  func.func @transform_3(%arg0: i32) -> (i32, i32) {
    %c0_i32 = arith.constant 0 : i32
    %c0_i32_0 = arith.constant 0 : i32
    %c0_i32_1 = arith.constant 0 : i32
    return %c0_i32, %c0_i32_0 : i32, i32
  }
  func.func @transform_4(%arg0: i32) -> (i32, i32) {
    %c0_i32 = arith.constant 0 : i32
    %c0_i32_0 = arith.constant 0 : i32
    %c0_i32_1 = arith.constant 0 : i32
    return %c0_i32, %c0_i32_0 : i32, i32
  }
  func.func @transform_5(%arg0: i32) -> (i32, i32) {
    %c0_i32 = arith.constant 0 : i32
    %c0_i32_0 = arith.constant 0 : i32
    %c0_i32_1 = arith.constant 0 : i32
    return %c0_i32, %c0_i32_0 : i32, i32
  }
  func.func @transform_6(%arg0: i32) -> (i32, i32) {
    %c0_i32 = arith.constant 0 : i32
    %c0_i32_0 = arith.constant 0 : i32
    %c0_i32_1 = arith.constant 0 : i32
    return %c0_i32, %c0_i32_0 : i32, i32
  }
  func.func @transform_7(%arg0: i32) -> (i32, i32) {
    %c0_i32 = arith.constant 0 : i32
    %c0_i32_0 = arith.constant 0 : i32
    return %arg0, %c0_i32 : i32, i32
  }
}

</mosaic_0001>

<bundles_post_ra>
// kernel: tpu_custom_call.1
= control target key start
LH: loop header
LB: loop body
LE: loop exit
PB: predicated region body
PF: predicated region fallthrough
CT: control target
= control target key end

     0   :  { %s2078_s0 = inlined_call_operand.hbm [shape: f32[32,784], index: 0, kind: input, shape index: {}]   ;;  %s2079_s1 = inlined_call_operand.hbm [shape: bf16[784,128], index: 1, kind: input, shape index: {}]   ;;  %s2080_s2 = inlined_call_operand.vmem [shape: f32[1,128], index: 2, kind: input, shape index: {}]   ;;  %s2081_s3 = inlined_call_operand.hbm [shape: bf16[128,128], index: 3, kind: input, shape index: {}]   ;;  %s2082_s4 = inlined_call_operand.vmem [shape: f32[1,128], index: 4, kind: input, shape index: {}]   ;;  %s2083_s5 = inlined_call_operand.hbm [shape: bf16[128,128], index: 5, kind: input, shape index: {}]   ;;  %s2084_s6 = inlined_call_operand.vmem [shape: f32[1,128], index: 6, kind: input, shape index: {}]   ;;  %s2085_s7 = inlined_call_operand.hbm [shape: f32[32,128], index: 7, kind: output, shape index: {}]  }
   0x1   :  { %2086 = sst [smem:[#allocation15_spill]] %s2079_s1 }
   0x2   :  { %2087 = sst [smem:[#allocation16_spill]] %s2081_s3 }
   0x3   :  { %2088 = sst [smem:[#allocation17_spill]] %s2083_s5 }
   0x4   :  { %12 = vsyncpa [#allocation3], 0 }
   0x5   :  { %14 = vsyncpa [#allocation3 + $0x1], 0 }
   0x6   :  { %15 = vsyncpa [#allocation6], 0 }
   0x7   :  { %16 = vsyncpa [#allocation9], 0 }
   0x8   :  { %17 = vsyncpa [#allocation4], 0 }
   0x9   :  { %19 = vsyncpa [#allocation4 + $0x1], 0  ;;  %s1894_s24 = smov 0   ;;  %s1896_s25 = smov 0  }
   0xa   :  { %s1898_s26 = smov 0   ;;  %s1900_s27 = smov 0  }
   0xb LB: > { %s1915_s28 = sadd.s32 4294967295, %s1843_s27   ;;  %s1206_s29 = sadd.s32 4294967294, %s1843_s27   ;;  %s1843_s27 = sphi %s1900_s27, %s2102_s27   ;;  %s1839_s26 = sphi %s1898_s26, %s2101_s26   ;;  %s1835_s25 = sphi %s1896_s25, %s2100_s25   ;;  %s1831_s24 = sphi %s1894_s24, %s2099_s24  }
   0xc   : > { %p45_p0 = scmp.ne.s32.totalorder %s1835_s25, %s1831_s24  ;;  %p46_p1 = scmp.eq.s32.totalorder %s1915_s28, 0 }
   0xd   : > { %p195_p2 = scmp.eq.s32.totalorder %s1915_s28, 1  ;;  %p201_p3 = scmp.eq.s32.totalorder %s1206_s29, 1 }
   0xe   : > { %p1924_p4 = por %p46_p1, %p45_p0  ;;  %p1207_p5 = scmp.ge.s32.totalorder %s1843_s27, 1 }
   0xf   : > { %p1929_p6 = por %p201_p3, %p45_p0  ;;  %p208_p7 = scmp.lt.s32.totalorder %s1843_s27, 3 }
  0x10   : > { %s2091_s1 = sld [smem:[#allocation15_spill]]  ;;  %s1845_s13 = smov [#allocation5]  }
  0x11   : > { %p1937_p8 = pnand %p1207_p5, %p208_p7  ;;  %s221_s14 = sshll.u32 %s1845_s13, 4  ;;  %s222_s14 = int_to_ptr.vmem [resolvable:$true] %s221_s14 }
  0x12   : > { %s2094_s3 = sld [smem:[#allocation16_spill]]  ;;  %s1846_s19 = smov 64  }
  0x13   : > { %p1571_p9 = pneg %p1937_p8  ;;  %s1847_s20 = smov 4  }
  0x14   : > { %s1848_s21 = smov [#allocation7]   ;;  %s2095_s5 = sld [smem:[#allocation17_spill]] }
  0x15   : > { %p1945_p10 = pnand %p1571_p9, %p46_p1  ;;  %s238_s22 = sshll.u32 %s1848_s21, 4  ;;  %s239_s22 = int_to_ptr.vmem [resolvable:$true] %s238_s22 }
  0x16   : > { %s219_s11 = sshll.u32 %s2091_s1, 4  ;;  %s1849_s10 = smov [#allocation8]   ;;  %s220_s11 = int_to_ptr.hbm [resolvable:$true] %s219_s11 }
  0x17   : > { %1574 = dma.hbm_to_vmem [thread:$0]  (!%p1945_p10), %s220_s11, 6272, %s222_s14, [#allocation6], %s1846_s19, %s1846_s19, %s1847_s20  }
  0x18   : > { %s236_s18 = sshll.u32 %s2094_s3, 4  ;;  %s255_s13 = sshll.u32 %s1849_s10, 4  ;;  %s237_s18 = int_to_ptr.hbm [resolvable:$true] %s236_s18  ;;  %s256_s13 = int_to_ptr.vmem [resolvable:$true] %s255_s13 }
  0x19   : > { %1577 = dma.hbm_to_vmem [thread:$0]  (!%p1945_p10), %s237_s18, 1024, %s239_s22, [#allocation6], %s1846_s19, %s1846_s19, %s1847_s20  }
  0x1a   : > { %s253_s9 = sshll.u32 %s2095_s5, 4  ;;  %s1961_s11 = sadd.s32 1, %s1843_s27   ;;  %s254_s9 = int_to_ptr.hbm [resolvable:$true] %s253_s9 }
  0x1b   : > { %1580 = dma.hbm_to_vmem [thread:$0]  (!%p1945_p10), %s254_s9, 1024, %s256_s13, [#allocation9], %s1846_s19, %s1846_s19, %s1847_s20  }
  0x1c   : > { %s29_s14 = ssub.s32 %s1843_s27, %s1961_s11  ;;  %s32_s16 = sadd.s32 1, %s1839_s26 }
  0x1d   : > { %p30_p12 = scmp.eq.s32.totalorder %s29_s14, 0  ;;  %p39_p13 = scmp.ne.s32.totalorder %s1839_s26, %s1835_s25 }
  0x1e   : > { %p40_p0 = scmp.eq.s32.totalorder %s1843_s27, 0  ;;  %p1592_p3 = scmp.lt.s32.totalorder %s1843_s27, 2 }
  0x1f   : > { %s1973_s17 = scalar_select %p30_p12, %s1839_s26, %s32_s16  }
  0x20   : > { %p41_p5 = por %p40_p0, %p39_p13  ;;  %p1977_p7 = por %p195_p2, %p39_p13 }
  0x21   : > { %s272_s21 = sand.u32 1, %s1839_s26   ;;  %s1553_s22 = smul.u32 112, %s1843_s27 }
  0x22   : > { %s1552_s23 = smul.u32 112, %s272_s21  ;;  %p1986_p9 = pnand %p1592_p3, %p41_p5 }
  0x23   : > { %s282_s19 = scalar_lea.hbm %s2078_s0, %s1553_s22  ;;  %s273_s14 = scalar_lea.sflag [#allocation3], %s272_s21 }
  0x24   : > { %s283_s9 = sshll.u32 %s282_s19, 4  ;;  %s276_s10 = scalar_lea.vmem [#allocation2], %s1552_s23  ;;  %s284_s9 = int_to_ptr.hbm [resolvable:$true] %s283_s9 }
  0x25   : > { %s285_s13 = sshll.u32 %s276_s10, 4  ;;  %s1739_s16 = sshra.s32 %s284_s9, 4  ;;  %s286_s13 = int_to_ptr.vmem [resolvable:$true] %s285_s13  ;;  %s1740_s16 = int_to_ptr.hbm [resolvable:$true] %s1739_s16 }
  0x26   : > { %s1741_s1 = scalar_lea.hbm %s1740_s16, 112  ;;  %p1743_p10 = pneg %p1986_p9 }
  0x27   : > { %p1742_p2 = scmp.ne.s32.totalorder %s1740_s16, %s1741_s1  ;;  %s1746_s29 = scalar_lea.hbm %s2078_s0, 224 }
  0x28   : > { %p1747_p0 = scmp.lt.s32.totalorder %s1740_s16, %s2078_s0  ;;  %p1748_p3 = scmp.lt.s32.totalorder %s1746_s29, %s1741_s1 }
  0x29   : > { %p1744_p12 = pnand %p1743_p10, %p1742_p2 }
  0x2a   : > { %p1749_p5 = por %p1748_p3, %p1747_p0 }
  0x2b   : > { %p1745_p13 = pneg %p1744_p12 }
  0x2d   : > { %p1750_p11 = pnand %p1749_p5, %p1745_p13 }
  0x2f   : > { %1753 = shalt.err (!%p1750_p11)
}
  0x30   : > { %s1850_s21 = smov 896   ;;  %s1851_s23 = smov 56  }
  0x31   : > { %1584 = dma.hbm_to_vmem [thread:$0]  (!%p1986_p9), %s284_s9, 1792, %s286_s13, %s273_s14, %s1850_s21, %s1850_s21, %s1851_s23  }
  0x32   : > { %297 = sbr.rel (%p1937_p8) target bundleno = 822 (0x336), region = 48  ;;  %s2003_s19 = sand.u32 (!%p1937_p8), 1, %s1835_s25  }
  0x33   : > { %s1554_s3 = smul.u32 (!%p1937_p8), 112, %s2003_s19  ;;  %s300_s5 = scalar_lea.sflag (!%p1937_p8), [#allocation3], %s2003_s19 }
  0x35   : > { %s2007_s1 = scalar_lea.vmem (!%p1937_p8), [#allocation2], %s1554_s3 }
  0x37   : > { %1814 = dma.done.wait (%p1924_p4), %s300_s5, 1792  }
  0x38   : > { %1816 = vsyncadd (%p1924_p4), %s300_s5, 4294965504 }
  0x39   : > { %1818 = dma.done.wait (%p46_p1), [#allocation6], 7296  }
  0x3a   : > { %1820 = vsyncadd (%p46_p1), [#allocation6], 4294960000 }
  0x3b   : > { %1822 = dma.done.wait (%p46_p1), [#allocation9], 1024  }
  0x3c   : > { %1824 = vsyncadd (%p46_p1), [#allocation9], 4294966272  ;;  %v1493_v0 = vld [vmem:[#allocation5 + $0x38] sm:$0xff]  ;;  %v1492_v4 = vld [vmem:[#allocation5 + $0x30] sm:$0xff]  ;;  %vm770_vm0 = vcmask 130048   ;;  %s1219_s14 = sshll.u32 %s2003_s19, 4 }
  0x3d   : > { %v1501_v1 = vld [vmem:[#allocation5 + $0x78] sm:$0xff]  ;;  %774 = vmatpush.bf16.msra.mxu0 %v1493_v0  ;;  %v1500_v5 = vld [vmem:[#allocation5 + $0x70] sm:$0xff]  ;;  %v1491_v8 = vld [vmem:[#allocation5 + $0x28] sm:$0xff]  ;;  %s1551_s16 = sshll.u32 %s1915_s28, 4  ;;  %s349_s21 = scalar_lea.vmem [#allocation10], %s1219_s14 }
  0x3e   : > { %v1509_v2 = vld [vmem:[#allocation5 + $0xb8] sm:$0xff]  ;;  %788 = vmatpush.bf16.msra.mxu1 %v1501_v1  ;;  %v1508_v6 = vld [vmem:[#allocation5 + $0xb0] sm:$0xff]  ;;  %v1499_v9 = vld [vmem:[#allocation5 + $0x68] sm:$0xff]  ;;  %s1100_s29 = scalar_lea.hbm %s2085_s7, %s1551_s16  ;;  %s1101_s23 = sshll.u32 %s349_s21, 4  ;;  %s1102_s23 = int_to_ptr.vmem [resolvable:$true] %s1101_s23 }
  0x3f   : > { %v1517_v3 = vld [vmem:[#allocation5 + $0xf8] sm:$0xff]  ;;  %802 = vmatpush.bf16.msra.mxu2 %v1509_v2  ;;  %v1516_v7 = vld [vmem:[#allocation5 + $0xf0] sm:$0xff]  ;;  %v1507_v10 = vld [vmem:[#allocation5 + $0xa8] sm:$0xff]  ;;  %s1103_s3 = sshll.u32 %s1100_s29, 4  ;;  %s1089_s28 = scalar_lea.sflag [#allocation4], %s2003_s19  ;;  %s1104_s3 = int_to_ptr.hbm [resolvable:$true] %s1103_s3 }
  0x40   : > { %816 = vmatpush.bf16.msra.mxu3 %v1517_v3  ;;  %v1515_v11 = vld [vmem:[#allocation5 + $0xe8] sm:$0xff]  ;;  %v1490_v12 = vld [vmem:[#allocation5 + $0x20] sm:$0xff]  ;;  %v1489_v16 = vld [vmem:[#allocation5 + $0x18] sm:$0xff]  ;;  %s1783_s5 = sshra.s32 %s1104_s3, 4  ;;  %s1789_s20 = scalar_lea.hbm %s2085_s7, 32  ;;  %s1784_s5 = int_to_ptr.hbm [resolvable:$true] %s1783_s5 }
  0x41   : > { %775 = vmatpush.bf16.msra.mxu0 %v1492_v4  ;;  %v1498_v13 = vld [vmem:[#allocation5 + $0x60] sm:$0xff]  ;;  %v1497_v17 = vld [vmem:[#allocation5 + $0x58] sm:$0xff]  ;;  %v1488_v20 = vld [vmem:[#allocation5 + $0x10] sm:$0xff]  ;;  %p1790_p11 = scmp.lt.s32.totalorder %s1784_s5, %s2085_s7 }
  0x42   : > { %789 = vmatpush.bf16.msra.mxu1 %v1500_v5  ;;  %v1506_v14 = vld [vmem:[#allocation5 + $0xa0] sm:$0xff]  ;;  %v1505_v18 = vld [vmem:[#allocation5 + $0x98] sm:$0xff]  ;;  %v1496_v21 = vld [vmem:[#allocation5 + $0x50] sm:$0xff] }
  0x43   : > { %803 = vmatpush.bf16.msra.mxu2 %v1508_v6  ;;  %v1514_v15 = vld [vmem:[#allocation5 + $0xe0] sm:$0xff]  ;;  %v1513_v19 = vld [vmem:[#allocation5 + $0xd8] sm:$0xff]  ;;  %v1504_v22 = vld [vmem:[#allocation5 + $0x90] sm:$0xff] }
  0x44   : > { %817 = vmatpush.bf16.msra.mxu3 %v1516_v7  ;;  %v1512_v23 = vld [vmem:[#allocation5 + $0xd0] sm:$0xff]  ;;  %v1487_v24 = vld [vmem:[#allocation5 + $0x8] sm:$0xff]  ;;  %v1486_v28 = vld [vmem:[#allocation5] sm:$0xff] }
  0x45   : > { %776 = vmatpush.bf16.msra.mxu0 %v1491_v8  ;;  %v1495_v25 = vld [vmem:[#allocation5 + $0x48] sm:$0xff]  ;;  %v1494_v29 = vld [vmem:[#allocation5 + $0x40] sm:$0xff]  ;;  %v1525_v34 = vld [vmem:[#allocation5 + $0x138] sm:$0xff] }
  0x46   : > { %790 = vmatpush.bf16.msra.mxu1 %v1499_v9  ;;  %v1503_v26 = vld [vmem:[#allocation5 + $0x88] sm:$0xff]  ;;  %v353_v30 = vld [vmem:[%s2007_s1] sm:$0xff]  ;;  %v1533_v35 = vld [vmem:[#allocation5 + $0x178] sm:$0xff] }
  0x47   : > { %804 = vmatpush.bf16.msra.mxu2 %v1507_v10  ;;  %v1511_v27 = vld [vmem:[#allocation5 + $0xc8] sm:$0xff]  ;;  %v361_v33 = vld [vmem:[%s2007_s1 + $0x40] sm:$0xff]  ;;  %v355_v38 = vld [vmem:[%s2007_s1 + $0x10] sm:$0xff] }
  0x48   : > { %818 = vmatpush.bf16.msra.mxu3 %v1515_v11  ;;  %v360_v31 = vld [vmem:[%s2007_s1 + $0x38] sm:$0xff]  ;;  %v354_v32 = vld [vmem:[%s2007_s1 + $0x8] sm:$0xff]  ;;  %v1502_v36 = vld [vmem:[#allocation5 + $0x80] sm:$0xff] }
  0x49   : > { %777 = vmatpush.bf16.msra.mxu0 %v1490_v12  ;;  %v1510_v37 = vld [vmem:[#allocation5 + $0xc0] sm:$0xff]  ;;  %v362_v39 = vld [vmem:[%s2007_s1 + $0x48] sm:$0xff]  ;;  %v367_v40 = vpack.c.bf16 %v360_v31, %v353_v30  ;;  %v356_v41 = vld [vmem:[%s2007_s1 + $0x18] sm:$0xff]  ;;  %v368_v43 = vpack.c.bf16 %v361_v33, %v354_v32 }
  0x4a   : > { %791 = vmatpush.bf16.msra.mxu1 %v1498_v13  ;;  %v363_v42 = vld [vmem:[%s2007_s1 + $0x50] sm:$0xff]  ;;  %v369_v47 = vpack.c.bf16 %v362_v39, %v355_v38  ;;  %v1523_v49 = vld [vmem:[#allocation5 + $0x128] sm:$0xff]  ;;  %v1521_v53 = vld [vmem:[#allocation5 + $0x118] sm:$0xff] }
  0x4b   : > { %805 = vmatpush.bf16.msra.mxu2 %v1506_v14  ;;  %v1534_v44 = vld [vmem:[#allocation5 + $0x180] sm:$0xff]  ;;  %v1524_v45 = vld [vmem:[#allocation5 + $0x130] sm:$0xff]  ;;  %v370_v48 = vpack.c.bf16 %v363_v42, %v356_v41  ;;  %v1531_v50 = vld [vmem:[#allocation5 + $0x168] sm:$0xff] }
  0x4c   : > { %819 = vmatpush.bf16.msra.mxu3 %v1514_v15  ;;  %v1532_v46 = vld [vmem:[#allocation5 + $0x170] sm:$0xff]  ;;  %v1522_v51 = vld [vmem:[#allocation5 + $0x120] sm:$0xff]  ;;  %v1529_v54 = vld [vmem:[#allocation5 + $0x158] sm:$0xff] }
  0x4d   : > { %778 = vmatpush.bf16.msra.mxu0 %v1489_v16  ;;  %v1530_v52 = vld [vmem:[#allocation5 + $0x160] sm:$0xff]  ;;  %v366_v56 = vld [vmem:[%s2007_s1 + $0x68] sm:$0xff]  ;;  %v1520_v57 = vld [vmem:[#allocation5 + $0x110] sm:$0xff] }
  0x4e   : > { %792 = vmatpush.bf16.msra.mxu1 %v1497_v17  ;;  %v359_v55 = vld [vmem:[%s2007_s1 + $0x30] sm:$0xff]  ;;  %v1519_v60 = vld [vmem:[#allocation5 + $0x108] sm:$0xff]  ;;  %v357_v0 = vld [vmem:[%s2007_s1 + $0x20] sm:$0xff] }
  0x4f   : > { %806 = vmatpush.bf16.msra.mxu2 %v1505_v18  ;;  %v1528_v58 = vld [vmem:[#allocation5 + $0x150] sm:$0xff]  ;;  %v373_v59 = vpack.c.bf16 %v366_v56, %v359_v55  ;;  %v1527_v61 = vld [vmem:[#allocation5 + $0x148] sm:$0xff]  ;;  %v1518_v62 = vld [vmem:[#allocation5 + $0x100] sm:$0xff] }
  0x50   : > { %820 = vmatpush.bf16.msra.mxu3 %v1513_v19  ;;  %v1526_v63 = vld [vmem:[#allocation5 + $0x140] sm:$0xff]  ;;  %v364_v1 = vld [vmem:[%s2007_s1 + $0x58] sm:$0xff]  ;;  %v358_v2 = vld [vmem:[%s2007_s1 + $0x28] sm:$0xff] }
  0x51   : > { %779 = vmatpush.bf16.msra.mxu0 %v1488_v20  ;;  %v365_v3 = vld [vmem:[%s2007_s1 + $0x60] sm:$0xff]  ;;  %v371_v4 = vpack.c.bf16 %v364_v1, %v357_v0  ;;  %v1541_v7 = vld [vmem:[#allocation7 + $0x30] sm:$0xff]  ;;  %v1539_v9 = vld [vmem:[#allocation7 + $0x20] sm:$0xff]  ;;  %s1785_s1 = scalar_lea.hbm %s1784_s5, 16 }
  0x52   : > { %793 = vmatpush.bf16.msra.mxu1 %v1496_v21  ;;  %v372_v5 = vpack.c.bf16 %v365_v3, %v358_v2  ;;  %v1542_v6 = vld [vmem:[#allocation7 + $0x38] sm:$0xff]  ;;  %v1540_v8 = vld [vmem:[#allocation7 + $0x28] sm:$0xff]  ;;  %v1537_v11 = vld [vmem:[#allocation7 + $0x10] sm:$0xff]  ;;  %p1786_p1 = scmp.ne.s32.totalorder %s1784_s5, %s1785_s1  ;;  %p1791_p9 = scmp.lt.s32.totalorder %s1789_s20, %s1785_s1 }
  0x53   : > { %807 = vmatpush.bf16.msra.mxu2 %v1504_v22  ;;  %v1538_v10 = vld [vmem:[#allocation7 + $0x18] sm:$0xff]  ;;  %v1536_v12 = vld [vmem:[#allocation7 + $0x8] sm:$0xff]  ;;  %v1535_v16 = vld [vmem:[#allocation7] sm:$0xff] }
  0x54   : > { %821 = vmatpush.bf16.msra.mxu3 %v1512_v23  ;;  %v1638_v17 = vld [vmem:[%s2080_s2] ss:$0 sm:$0xff]  ;;  %v1549_v20 = vld [vmem:[#allocation8 + $0x30] sm:$0xff]  ;;  %p1787_p4 = pnand %p1786_p1, %p1977_p7  ;;  %p1792_p2 = por %p1791_p9, %p1790_p11 }
  0x55   : > { %780 = vmatpush.bf16.msra.mxu0 %v1487_v24  ;;  %v1550_v18 = vld [vmem:[#allocation8 + $0x38] sm:$0xff] }
  0x56   : > { %794 = vmatpush.bf16.msra.mxu1 %v1495_v25  ;;  %v1548_v25 = vld [vmem:[#allocation8 + $0x28] sm:$0xff]  ;;  %v1639_v55 = vld [vmem:[%s2082_s4] ss:$0 sm:$0xff]  ;;  %p1788_p8 = pneg %p1787_p4 }
  0x57   : > { %808 = vmatpush.bf16.msra.mxu2 %v1503_v26 }
  0x58   : > { %822 = vmatpush.bf16.msra.mxu3 %v1511_v27  ;;  %p1793_p10 = pnand %p1792_p2, %p1788_p8 }
  0x59   : > { %781 = vmatpush.bf16.msra.mxu0 %v1486_v28 }
  0x5a   : > { %795 = vmatpush.bf16.msra.mxu1 %v1494_v29  ;;  %v1547_v29 = vld [vmem:[#allocation8 + $0x20] sm:$0xff] }
  0x5b   : > { %809 = vmatpush.bf16.msra.mxu2 %v1502_v36 }
  0x5c   : > { %823 = vmatpush.bf16.msra.mxu3 %v1510_v37  ;;  %782 = vmatmul.bf16.vlgmr.msra.gmra.mxu0 %v367_v40 }
  0x5d   : > { %830 = vmatpush.bf16.msrb.mxu0 %v1525_v34  ;;  %796 = vmatmul.bf16.vlgmr.msra.gmra.mxu1 %v368_v43 }
  0x5e   : > { %844 = vmatpush.bf16.msrb.mxu1 %v1533_v35  ;;  %810 = vmatmul.bf16.vlgmr.msra.gmra.mxu2 %v369_v47 }
  0x5f   : > { %865 = vmatpush.bf16.msrb.mxu2 %v1534_v44  ;;  %824 = vmatmul.bf16.vlgmr.msra.gmra.mxu3 %v370_v48 }
  0x60   : > { %943 = vmatpush.bf16.msrb.mxu3 %v1542_v6 }
  0x61   : > { %831 = vmatpush.bf16.msrb.mxu0 %v1524_v45 }
  0x62   : > { %845 = vmatpush.bf16.msrb.mxu1 %v1532_v46 }
  0x63   : > { %1028 = vmatpush.bf16.msra.mxu2 %v1550_v18 }
  0x64   : > { %944 = vmatpush.bf16.msrb.mxu3 %v1541_v7 }
  0x65   : > { %832 = vmatpush.bf16.msrb.mxu0 %v1523_v49 }
  0x66   : > { %846 = vmatpush.bf16.msrb.mxu1 %v1531_v50  ;;  %v1546_v50 = vld [vmem:[#allocation8 + $0x18] sm:$0xff] }
  0x67   : > { %1029 = vmatpush.bf16.msra.mxu2 %v1549_v20 }
  0x68   : > { %945 = vmatpush.bf16.msrb.mxu3 %v1540_v8 }
  0x69   : > { %833 = vmatpush.bf16.msrb.mxu0 %v1522_v51  ;;  %v1545_v51 = vld [vmem:[#allocation8 + $0x10] sm:$0xff] }
  0x6a   : > { %847 = vmatpush.bf16.msrb.mxu1 %v1530_v52  ;;  %v1544_v52 = vld [vmem:[#allocation8 + $0x8] sm:$0xff] }
  0x6b   : > { %1030 = vmatpush.bf16.msra.mxu2 %v1548_v25 }
  0x6c   : > { %946 = vmatpush.bf16.msrb.mxu3 %v1539_v9 }
  0x6d   : > { %834 = vmatpush.bf16.msrb.mxu0 %v1521_v53  ;;  %v1543_v53 = vld [vmem:[#allocation8] sm:$0xff] }
  0x6e   : > { %848 = vmatpush.bf16.msrb.mxu1 %v1529_v54  ;;  %1416 = vmatmul.msk.bf16.vlgmr.msrb.gmra.mxu2 %vm770_vm0, %v373_v59 }
  0x6f   : > { %1031 = vmatpush.bf16.msra.mxu2 %v1547_v29 }
  0x70   : > { %947 = vmatpush.bf16.msrb.mxu3 %v1538_v10 }
  0x71   : > { %835 = vmatpush.bf16.msrb.mxu0 %v1520_v57 }
  0x72   : > { %849 = vmatpush.bf16.msrb.mxu1 %v1528_v58 }
  0x73   : > { %1032 = vmatpush.bf16.msra.mxu2 %v1546_v50 }
  0x74   : > { %948 = vmatpush.bf16.msrb.mxu3 %v1537_v11 }
  0x75   : > { %836 = vmatpush.bf16.msrb.mxu0 %v1519_v60 }
  0x76   : > { %850 = vmatpush.bf16.msrb.mxu1 %v1527_v61 }
  0x77   : > { %1033 = vmatpush.bf16.msra.mxu2 %v1545_v51 }
  0x78   : > { %949 = vmatpush.bf16.msrb.mxu3 %v1536_v12 }
  0x79   : > { %837 = vmatpush.bf16.msrb.mxu0 %v1518_v62  ;;  %v1640_v62 = vld [vmem:[%s2084_s6] ss:$0 sm:$0xff] }
  0x7a   : > { %851 = vmatpush.bf16.msrb.mxu1 %v1526_v63 }
  0x7b   : > { %1034 = vmatpush.bf16.msra.mxu2 %v1544_v52 }
  0x7c   : > { %838 = vmatmul.bf16.vlgmr.msrb.gmra.mxu0 %v371_v4  ;;  %950 = vmatpush.bf16.msrb.mxu3 %v1535_v16 }
  0x7d   : > { %852 = vmatmul.bf16.vlgmr.msrb.gmra.mxu1 %v372_v5 }
  0x7f   : > { %1035 = vmatpush.bf16.msra.mxu2 %v1543_v53 }
  0xd9   : > { %v783_v13 = vpop.f32.mrf.mxu0 }
  0xda   : > { %v797_v14 = vpop.f32.mrf.mxu1  ;;  %v784_v19 = vadd.f32 %v1638_v17, %v783_v13 }
  0xdc   : > { %v798_v24 = vadd.f32 %v797_v14, %v784_v19 }
  0xe1   : > { %v811_v15 = vpop.f32.mrf.mxu2  ;;  %v785_v21 = vpop.f32.mrf.mxu0 }
  0xe2   : > { %v799_v22 = vpop.f32.mrf.mxu1  ;;  %v825_v26 = vpop.f32.mrf.mxu3  ;;  %v786_v27 = vadd.f32 %v1638_v17, %v785_v21  ;;  %v812_v28 = vadd.f32 %v811_v15, %v798_v24 }
  0xe4   : > { %v800_v30 = vadd.f32 %v799_v22, %v786_v27  ;;  %v826_v33 = vadd.f32 %v825_v26, %v812_v28 }
  0xe9   : > { %v813_v23 = vpop.f32.mrf.mxu2 }
  0xea   : > { %v814_v35 = vadd.f32 %v813_v23, %v800_v30  ;;  %v827_v37 = vpop.f32.mrf.mxu3 }
  0xec   : > { %v828_v38 = vadd.f32 %v827_v37, %v814_v35 }
  0xf1   : > { %v867_v34 = vpop.f32.mrf.mxu2 }
  0xf9   : > { %v839_v31 = vpop.f32.mrf.mxu0  ;;  %v869_v45 = vpop.f32.mrf.mxu2 }
  0xfa   : > { %v853_v32 = vpop.f32.mrf.mxu1  ;;  %v840_v36 = vadd.f32 %v839_v31, %v826_v33 }
  0xfc   : > { %v854_v39 = vadd.f32 %v853_v32, %v840_v36 }
  0xfe   : > { %v868_v43 = vadd.f32 %v867_v34, %v854_v39 }
 0x100   : > { %v872_v47 = vmax.f32 %v868_v43, 0.0 }
 0x101   : > { %v841_v40 = vpop.f32.mrf.mxu0 }
 0x102   : > { %v842_v41 = vadd.f32 %v841_v40, %v828_v38  ;;  %v855_v42 = vpop.f32.mrf.mxu1 }
 0x104   : > { %v856_v44 = vadd.f32 %v855_v42, %v842_v41 }
 0x106   : > { %v870_v46 = vadd.f32 %v869_v45, %v856_v44 }
 0x108   : > { %v873_v48 = vmax.f32 %v870_v46, 0.0 }
 0x10a   : > { %v874_v49 = vpack.c.bf16 %v873_v48, %v872_v47 }
 0x10c   : > { %951 = vmatmul.bf16.vlgmr.msrb.gmra.mxu3 %v874_v49 }
 0x18f   : > { %v952_v54 = vpop.f32.mrf.mxu3 }
 0x190   : > { %v953_v56 = vadd.f32 %v1639_v55, %v952_v54 }
 0x192   : > { %v957_v59 = vmax.f32 %v953_v56, 0.0 }
 0x197   : > { %v954_v57 = vpop.f32.mrf.mxu3 }
 0x198   : > { %v955_v58 = vadd.f32 %v1639_v55, %v954_v57 }
 0x19a   : > { %v958_v60 = vmax.f32 %v955_v58, 0.0 }
 0x19c   : > { %v959_v61 = vpack.c.bf16 %v958_v60, %v957_v59 }
 0x19e   : > { %1036 = vmatmul.bf16.vlgmr.msra.gmra.mxu2 %v959_v61 }
 0x221   : > { %v1037_v63 = vpop.f32.mrf.mxu2 }
 0x222   : > { %v1038_v0 = vadd.f32 %v1640_v62, %v1037_v63 }
 0x224   : > { %1042 = vmax.xlane.f32.xlu0 %v1038_v0 }
 0x229   : > { %v1039_v1 = vpop.f32.mrf.mxu2 }
 0x22a   : > { %v1040_v2 = vadd.f32 %v1640_v62, %v1039_v1 }
 0x22c   : > { %1044 = vmax.xlane.f32.xlu0 %v1040_v2 }
 0x297   : > { %v1043_v3 = vpop.xlane.xlu0 %1042 }
 0x298   : > { %v1046_v4 = vsub.f32 %v1038_v0, %v1043_v3 }
 0x29a   : > { %v1048_v5 = vmul.f32 1.442695, %v1046_v4 }
 0x29c   : > { %1641 = vpow2.f32 %v1048_v5 }
 0x29f   : > { %v1045_v6 = vpop.xlane.xlu0 %1044 }
 0x2a0   : > { %v1047_v7 = vsub.f32 %v1040_v2, %v1045_v6 }
 0x2a2   : > { %v1642_v8 = vpop.eup %1641  ;;  %v1050_v9 = vmul.f32 1.442695, %v1047_v7 }
 0x2a3   : > { %1052 = vadd.xlane.f32.xlu1 %v1642_v8 }
 0x2a4   : > { %1643 = vpow2.f32 %v1050_v9 }
 0x2aa   : > { %v1644_v10 = vpop.eup %1643 }
 0x2ab   : > { %1054 = vadd.xlane.f32.xlu1 %v1644_v10 }
 0x316   : > { %v1053_v11 = vpop.xlane.xlu1 %1052 }
 0x317   : > { %1645 = vrcp.f32 %v1053_v11  ;;  %v1067_v16 = vand.u32 2147483648, %v1053_v11  ;;  %v1065_v18 = vand.u32 2147483647, %v1053_v11  ;;  %vm1061_vm2 = vweird.f32 %v1053_v11 }
 0x319   : > { %v1068_v21 = vor.u32 1.1754944e-38, %v1067_v16  ;;  %vm1066_vm4 = vcmp.eq.f32.partialorder %v1065_v18, 8.507059e+37 }
 0x31d   : > { %v1646_v12 = vpop.eup %1645 }
 0x31e   : > { %v1057_v13 = vmul.f32 %v1646_v12, %v1053_v11  ;;  %v1055_v14 = vpop.xlane.xlu1 %1054  ;;  %vm1062_vm1 = vweird.f32 %v1646_v12 }
 0x31f   : > { %1647 = vrcp.f32 %v1055_v14  ;;  %vm1063_vm3 = vmor %vm1061_vm2, %vm1062_vm1  ;;  %v1082_v27 = vand.u32 2147483648, %v1055_v14  ;;  %v1080_v29 = vand.u32 2147483647, %v1055_v14  ;;  %vm1076_vm6 = vweird.f32 %v1055_v14 }
 0x320   : > { %v1058_v15 = vsub.f32 1.0, %v1057_v13 }
 0x321   : > { %v1083_v31 = vor.u32 1.1754944e-38, %v1082_v27  ;;  %vm1081_vm8 = vcmp.eq.f32.partialorder %v1080_v29, 8.507059e+37 }
 0x322   : > { %v1059_v17 = vmul.f32 %v1646_v12, %v1058_v15 }
 0x324   : > { %v1060_v19 = vadd.f32 %v1646_v12, %v1059_v17 }
 0x325   : > { %v1648_v20 = vpop.eup %1647 }
 0x326   : > { %v1064_v22 = vsel %vm1063_vm3, %v1646_v12, %v1060_v19  ;;  %v1072_v23 = vmul.f32 %v1648_v20, %v1055_v14  ;;  %vm1077_vm5 = vweird.f32 %v1648_v20 }
 0x327   : > { %v1069_v24 = vsel %vm1066_vm4, %v1068_v21, %v1064_v22  ;;  %vm1078_vm7 = vmor %vm1076_vm6, %vm1077_vm5 }
 0x328   : > { %v1070_v25 = vmul.f32 %v1642_v8, %v1069_v24  ;;  %v1073_v26 = vsub.f32 1.0, %v1072_v23 }
 0x32a   : > { %v1074_v28 = vmul.f32 %v1648_v20, %v1073_v26  ;;  %1086 = vst [vmem:[%s349_s21] sm:$0xff] %v1070_v25 }
 0x32c   : > { %v1075_v30 = vadd.f32 %v1648_v20, %v1074_v28 }
 0x32e   : > { %v1079_v32 = vsel %vm1078_vm7, %v1648_v20, %v1075_v30 }
 0x32f   : > { %v1084_v33 = vsel %vm1081_vm8, %v1083_v31, %v1079_v32 }
 0x330   : > { %v1085_v34 = vmul.f32 %v1644_v10, %v1084_v33 }
 0x332   : > { %1087 = vst [vmem:[%s349_s21 + $0x8] sm:$0xff] %v1085_v34 }
 0x333   : > { %1796 = shalt.err (!%p1793_p10)
}
 0x334   : > { %s1852_s19 = smov 128   ;;  %s1853_s13 = smov 8  }
 0x335   : > { %1569 = dma.vmem_to_hbm [thread:$0]  (%p1977_p7), %s1102_s23, 256, %s1104_s3, %s1089_s28, %s1852_s19, %s1852_s19, %s1853_s13  }
 0x336 PF: > { %s1118_s14 = sand.u32 1, %s1831_s24   ;;  %p2098_p12 = scmp.ge.s32.totalorder %s1843_s27, 2 }
 0x337   : > { %s1119_s16 = scalar_lea.sflag [#allocation4], %s1118_s14 }
 0x338   : > { %p1586_p13 = pnand %p2098_p12, %p1929_p6 }
 0x33a   : > { %p1587_p0 = pneg %p1586_p13 }
 0x33c   : > { %1826 = dma.done.wait (%p1587_p0), %s1119_s16, 256  }
 0x33d   : > { %1828 = vsyncadd (%p1587_p0), %s1119_s16, 4294967040  ;;  %p22_p3 = scmp.ge.s32.totalorder %s1961_s11, 4   ;;  %s2099_s24 = smov %s1835_s25 }
 0x33e   : > { %s2100_s25 = smov %s1839_s26  ;;  %s2101_s26 = smov %s1973_s17 }
 0x33f   : > { %s2102_s27 = smov %s1961_s11  ;;  %24 = sbr.rel (!%p22_p3) target bundleno = 11 (0xb), region = 105 }
 0x344   :  { %1125 = vsyncpa [#allocation3], 1 }
 0x345   :  { %1127 = vsyncpa [#allocation3 + $0x1], 1 }
 0x346   :  { %1128 = vsyncpa [#allocation6], 1 }
 0x347   :  { %1129 = vsyncpa [#allocation9], 1 }
 0x348   :  { %1130 = vsyncpa [#allocation4], 1 }
 0x349   :  { %1132 = vsyncpa [#allocation4 + $0x1], 1 }

</bundles_post_ra>
